<compile_context>
chip_gen: v7x
topology: tpu7x:2x2x1
jax: 0.10.0
libtpu: 0.0.40
codegen_flags: <defaults>
</compile_context>

<pallas_src>
import functools

import jax
import jax.numpy as jnp
from jax.experimental import pallas as pl
from jax.experimental.pallas import tpu as pltpu


def _round_up(x, m):
    return ((x + m - 1) // m) * m


def _cdiv(a, b):
    return (a + b - 1) // b


def _vmem_budgets():
    """(tile budget, vmem_limit_bytes) sized per TPU generation."""
    try:
        cap = int(getattr(pltpu.get_tpu_info(), "vmem_capacity_bytes", 0))
    except Exception:
        cap = 0
    if cap >= (96 << 20):            # v5e / v6e / v4 / v5p: 128 MiB physical VMEM
        return 44 << 20, 96 << 20
    if cap > 0:                      # v7x-class: 64 MiB physical VMEM
        return 18 << 20, 40 << 20
    return 24 << 20, 48 << 20        # unknown: conservative middle ground


def _largest_divisor_tile(total, limit):
    """Largest multiple of 128 that divides `total` (a multiple of 128) and is <= limit."""
    q = total // 128
    dmax = max(1, min(q, limit // 128))
    for d in range(dmax, 0, -1):
        if q % d == 0:
            return 128 * d
    return 128


# ----------------------------------------------------------------------------
# Stage 1: fused 1x1 conv + BatchNorm(eval) + ReLU, output in (B, Cout, pixels) layout
# ----------------------------------------------------------------------------
def _conv_bn_relu_kernel(x_ref, w_ref, b_ref, o_ref):
    # x_ref: (1, Cin_p, tp)   w_ref: (Cout_p, Cin_p)   b_ref: (Cout_p, 1)
    # o_ref: (1, Cout_p, tp)
    y = jnp.dot(w_ref[...], x_ref[0], preferred_element_type=jnp.float32)
    y = y + b_ref[...]
    o_ref[0] = jnp.maximum(y, 0.0).astype(o_ref.dtype)


def _fold_bn(conv_w, conv_b, gamma, beta, mean, var, eps, post_scale):
    s = gamma * jax.lax.rsqrt(var + eps)
    w_f = conv_w * s[:, None]
    b_f = s * (conv_b - mean) + beta
    if post_scale != 1.0:            # ReLU(s * z) = s * ReLU(z) for s > 0
        w_f = w_f * post_scale
        b_f = b_f * post_scale
    return w_f.astype(jnp.float32), b_f.astype(jnp.float32)


def conv1x1_bn_relu_matrix(x, conv_w, conv_b, gamma, beta, mean, var, *,
                           eps=1e-5, post_scale=1.0, kp=None,
                           budget_bytes=None, vmem_limit=None):
    """x: (B, Cin, r, c) -> (B, Cout_p, kp) f32, Cout_p = round_up(Cout, 8).

    The pixel axis (r*c) is zero-padded to `kp`, so a zero-copy reshape to
    (B*Cout_p, kp) is exactly what the HT matmul consumes.
    """
    B, Cin, r, c = x.shape
    Cout = conv_w.shape[0]
    P = r * c
    if kp is None:
        kp = _round_up(P, 128)
    if budget_bytes is None or vmem_limit is None:
        b0, l0 = _vmem_budgets()
        budget_bytes = b0 if budget_bytes is None else budget_bytes
        vmem_limit = l0 if vmem_limit is None else vmem_limit

    Cin_p = _round_up(Cin, 8)
    Cout_p = _round_up(Cout, 8)
    w_f, b_f = _fold_bn(conv_w, conv_b, gamma, beta, mean, var, eps, post_scale)
    w_p = jnp.zeros((Cout_p, Cin_p), jnp.float32).at[:Cout, :Cin].set(w_f)
    b_p = jnp.zeros((Cout_p, 1), jnp.float32).at[:Cout, 0].set(b_f)

    x3 = x.reshape(B, Cin, P).astype(jnp.float32)        # zero-copy reshape
    if (Cin_p, kp) != (Cin, P):
        # Small one-time pad of the activations; the padded zero columns hit
        # zero-padded vote rows downstream so they never affect the result.
        x3 = jnp.pad(x3, ((0, 0), (0, Cin_p - Cin), (0, kp - P)))

    # Pixel tile: as large as the budget allows (stage 1 is HBM-bound), always a
    # divisor of kp, split so dual-core chips see >= 2 grid blocks.
    per_col = 8 * (Cin_p + Cout_p)                       # double-buffered f32 in + out
    tp = _largest_divisor_tile(kp, max(128, budget_bytes // per_col))
    if B * (kp // tp) < 2 and kp >= 256:
        tp = _largest_divisor_tile(kp, kp // 2)

    out = pl.pallas_call(
        _conv_bn_relu_kernel,
        out_shape=jax.ShapeDtypeStruct((B, Cout_p, kp), jnp.float32),
        grid_spec=pltpu.PrefetchScalarGridSpec(
            num_scalar_prefetch=0,
            grid=(B, kp // tp),
            in_specs=[
                pl.BlockSpec((1, Cin_p, tp), lambda b, j: (b, 0, j)),
                pl.BlockSpec((Cout_p, Cin_p), lambda b, j: (0, 0)),
                pl.BlockSpec((Cout_p, 1), lambda b, j: (0, 0)),
            ],
            out_specs=pl.BlockSpec((1, Cout_p, tp), lambda b, j: (b, 0, j)),
        ),
        compiler_params=pltpu.CompilerParams(
            dimension_semantics=("parallel", "parallel"),
            vmem_limit_bytes=vmem_limit),
    )(x3, w_p, b_p)
    return out, Cout_p


# ----------------------------------------------------------------------------
# Stage 2: HT voting matmul   relu(A) @ V * inv_norm    (V stored in bf16)
# ----------------------------------------------------------------------------
def _ht_vmem_use(tm, tk, tn):
    return (2 * 4 * tm * tk          # f32 activation tiles (double-buffered)
            + 2 * 2 * tk * tn        # bf16 vote tiles (double-buffered)
            + 2 * 4 * tm * tn        # f32 output tiles (double-buffered)
            + 2 * tm * tk)           # in-kernel bf16 copy of the activation tile


def _pick_tk(K, target):
    """Reduction tile (multiple of 128) trading zero-padding of K against step count."""
    kp_min = _round_up(K, 128)
    target = max(128, min(target, kp_min))
    best_tk, best_cost = 128, None
    tk = target
    while tk >= 128:
        kp = _round_up(K, tk)
        cost = (kp - kp_min) + 256 * (kp // tk)
        if best_cost is None or cost < best_cost:
            best_cost, best_tk = cost, tk
        tk -= 128
    return best_tk


def _choose_ht_tiles(K, N, budget_bytes, tm_cap):
    kp0 = _round_up(K, 128)
    np0 = _round_up(N, 128)
    tm = tm_cap
    # Preferred: collapse K entirely -> vote table streamed exactly once, no accumulator.
    tk = kp0
    tn = min(np0, 1024)
    while tn > 128 and _ht_vmem_use(tm, tk, tn) > budget_bytes:
        tn -= 128
    if _ht_vmem_use(tm, tk, tn) <= budget_bytes:
        return tk, tn, False
    # K stripe too large for VMEM: tile the reduction, accumulate into the output block.
    tn = min(np0, 512)
    tk = min(kp0, 2048)
    while tk > 512 and _ht_vmem_use(tm, tk, tn) > budget_bytes:
        tk -= 128
    while tn > 256 and _ht_vmem_use(tm, tk, tn) > budget_bytes:
        tn -= 128
    while tk > 128 and _ht_vmem_use(tm, tk, tn) > budget_bytes:
        tk -= 128
    return _pick_tk(K, tk), tn, True


def prepare_vote_index(vote_index, *, row_tile_cap=256, budget_bytes=None,
                       vmem_limit=None):
    """One-time preprocessing of the HT vote table (call this at model init).

    Reshapes to (r*c, h*w), zero-pads to the tile grid and stores it as bf16 (exact for
    0/1 votes -> half the HBM traffic of f32), and fixes the stage-2 tiling.
    """
    r, c, h, w = vote_index.shape
    K, N = r * c, h * w
    if budget_bytes is None or vmem_limit is None:
        b0, l0 = _vmem_budgets()
        budget_bytes = b0 if budget_bytes is None else budget_bytes
        vmem_limit = l0 if vmem_limit is None else vmem_limit
    tk, tn, use_acc = _choose_ht_tiles(K, N, budget_bytes, row_tile_cap)
    Kp, Np = _round_up(K, tk), _round_up(N, tn)
    v = vote_index.reshape(K, N).astype(jnp.bfloat16)
    if (Kp, Np) != (K, N):
        v = jnp.pad(v, ((0, Kp - K), (0, Np - N)))
    return dict(vote=v, r=r, c=c, h=h, w=w, K=K, N=N, Kp=Kp, Np=Np,
                tk=tk, tn=tn, use_acc=use_acc, tm_cap=row_tile_cap,
                inv_norm=1.0 / float(max(r, c)),
                budget_bytes=budget_bytes, vmem_limit=vmem_limit)


def _ht_kernel_noacc(a_ref, v_ref, o_ref, *, inv_norm, apply_relu):
    """K collapsed: single-shot matmul, vote stripe streamed once, no accumulator."""
    a = a_ref[...]
    if apply_relu:
        a = jnp.maximum(a, 0.0)
    y = jnp.dot(a.astype(jnp.bfloat16), v_ref[...],
                preferred_element_type=jnp.float32)
    if inv_norm != 1.0:
        y = y * inv_norm
    o_ref[...] = y.astype(o_ref.dtype)


def _ht_kernel_acc(a_ref, v_ref, o_ref, *, inv_norm, apply_relu):
    """K tiled: accumulate directly into the resident f32 output block (no scratch)."""
    k = pl.program_id(2)

    @pl.when(k == 0)
    def _():
        o_ref[...] = jnp.zeros_like(o_ref)

    a = a_ref[...]
    if apply_relu:
        a = jnp.maximum(a, 0.0)
    o_ref[...] += jnp.dot(a.astype(jnp.bfloat16), v_ref[...],
                          preferred_element_type=jnp.float32)

    if inv_norm != 1.0:
        @pl.when(k == pl.num_programs(2) - 1)
        def _():
            o_ref[...] = o_ref[...] * inv_norm


def ht_matmul(a, prep, *, apply_relu=True, apply_norm=True):
    """a: (M, Kp) f32 with columns [K, Kp) zero-padded.  Returns (M, Np) f32."""
    M, Kp = a.shape
    assert Kp == prep["Kp"], "activation K padding must match the prepared vote table"
    Np, tk, tn, use_acc = prep["Np"], prep["tk"], prep["tn"], prep["use_acc"]

    # Balanced row tile: avoids a nearly-empty trailing block (which would re-stream V).
    tm = min(_round_up(_cdiv(M, _cdiv(M, prep["tm_cap"])), 8), prep["tm_cap"])
    ni, nj = _cdiv(M, tm), _cdiv(Np, tn)
    # Guarantee >= 2 parallel output blocks so both TensorCores (v7x) get work.
    if ni * nj < 2:
        if Np >= 256:
            tn = _largest_divisor_tile(Np, Np // 2)
            nj = _cdiv(Np, tn)
        elif M >= 16:
            tm = _round_up(_cdiv(M, 2), 8)
            ni = _cdiv(M, tm)

    inv_norm = prep["inv_norm"] if apply_norm else 1.0
    if not use_acc:
        kernel = functools.partial(_ht_kernel_noacc, inv_norm=inv_norm,
                                   apply_relu=apply_relu)
        grid = (ni, nj)
        in_specs = [pl.BlockSpec((tm, Kp), lambda i, j: (i, 0)),
                    pl.BlockSpec((Kp, tn), lambda i, j: (0, j))]
        out_specs = pl.BlockSpec((tm, tn), lambda i, j: (i, j))
        dims = ("parallel", "parallel")
    else:
        kernel = functools.partial(_ht_kernel_acc, inv_norm=inv_norm,
                                   apply_relu=apply_relu)
        grid = (ni, nj, Kp // tk)
        in_specs = [pl.BlockSpec((tm, tk), lambda i, j, k: (i, k)),
                    pl.BlockSpec((tk, tn), lambda i, j, k: (k, j))]
        out_specs = pl.BlockSpec((tm, tn), lambda i, j, k: (i, j))
        dims = ("parallel", "parallel", "arbitrary")

    return pl.pallas_call(
        kernel,
        out_shape=jax.ShapeDtypeStruct((M, Np), jnp.float32),
        grid_spec=pltpu.PrefetchScalarGridSpec(
            num_scalar_prefetch=0,
            grid=grid,
            in_specs=in_specs,
            out_specs=out_specs,
        ),
        compiler_params=pltpu.CompilerParams(
            dimension_semantics=dims,
            vmem_limit_bytes=prep["vmem_limit"]),
    )(a.astype(jnp.float32), prep["vote"])


def ht_forward(image, vote):
    """Standalone HT module: relu(image) voted through vote_index / max(r, c)."""
    prep = vote if isinstance(vote, dict) else prepare_vote_index(vote)
    B, C, r, c = image.shape
    assert (r, c) == (prep["r"], prep["c"]), "image spatial dims must match vote_index"
    K = r * c
    a = image.reshape(B * C, K).astype(jnp.float32)
    if prep["Kp"] != K:
        a = jnp.pad(a, ((0, 0), (0, prep["Kp"] - K)))
    out = ht_matmul(a, prep, apply_relu=True, apply_norm=True)
    return out[:, :prep["N"]].reshape(B, C, prep["h"], prep["w"])


# ----------------------------------------------------------------------------
# Full DHT_Layer forward + pure-JAX references
# ----------------------------------------------------------------------------
def dht_layer_forward(x, vote, conv_w, conv_b, gamma, beta, mean, var, *, eps=1e-5):
    """DHT_Layer forward.  `vote` is a raw (r, c, h, w) table or the dict returned by
    prepare_vote_index (preferred: prepare once at init and reuse)."""
    prep = vote if isinstance(vote, dict) else prepare_vote_index(vote)
    B = x.shape[0]
    Cout = conv_w.shape[0]
    # 1/max(r,c) folded into the conv (ReLU commutes with a positive scale); the ReLU
    # already applied in stage 1 makes the HT-side ReLU redundant.
    a3, Cout_p = conv1x1_bn_relu_matrix(
        x, conv_w, conv_b, gamma, beta, mean, var, eps=eps,
        post_scale=prep["inv_norm"], kp=prep["Kp"],
        budget_bytes=prep["budget_bytes"], vmem_limit=prep["vmem_limit"])
    a = a3.reshape(B * Cout_p, prep["Kp"])               # zero-copy reshape
    out = ht_matmul(a, prep, apply_relu=False, apply_norm=False)
    out = out[:, :prep["N"]].reshape(B, Cout_p, prep["h"], prep["w"])
    if Cout_p != Cout:
        out = out[:, :Cout]
    return out


def ht_reference(image, vote_index):
    hp = jax.lax.Precision.HIGHEST
    B, C, r, c = image.shape
    _, _, h, w = vote_index.shape
    a = jnp.maximum(image.reshape(B * C, r * c), 0.0)
    v = vote_index.reshape(r * c, h * w).astype(jnp.float32)
    out = jnp.dot(a, v, precision=hp) / float(max(r, c))
    return out.reshape(B, C, h, w)


def dht_layer_reference(x, vote_index, conv_w, conv_b, gamma, beta, mean, var,
                        *, eps=1e-5):
    hp = jax.lax.Precision.HIGHEST
    y = jnp.einsum("oc,bcrs->bors", conv_w, x, precision=hp)
    y = y + conv_b[None, :, None, None]
    s = gamma / jnp.sqrt(var + eps)
    y = s[None, :, None, None] * (y - mean[None, :, None, None]) + beta[None, :, None, None]
    y = jnp.maximum(y, 0.0)
    return ht_reference(y, vote_index)


if __name__ == "__main__":
    key = jax.random.PRNGKey(0)
    ks = jax.random.split(key, 8)

    # Small shapes; r*c = 324 and h*w = 480 are NOT multiples of 128 -> exercises padding.
    B, Cin, Cout = 2, 4, 16
    r, c, h, w = 18, 18, 20, 24

    x = jax.random.normal(ks[0], (B, Cin, r, c), dtype=jnp.float32)
    vote_index = jax.random.bernoulli(ks[1], p=0.1, shape=(r, c, h, w)).astype(jnp.float32)

    conv_w = 0.5 * jax.random.normal(ks[2], (Cout, Cin), dtype=jnp.float32)
    conv_b = 0.1 * jax.random.normal(ks[3], (Cout,), dtype=jnp.float32)
    gamma = 1.0 + 0.1 * jax.random.normal(ks[4], (Cout,), dtype=jnp.float32)
    beta = 0.1 * jax.random.normal(ks[5], (Cout,), dtype=jnp.float32)
    running_mean = 0.1 * jax.random.normal(ks[6], (Cout,), dtype=jnp.float32)
    running_var = jnp.abs(1.0 + 0.1 * jax.random.normal(ks[7], (Cout,), dtype=jnp.float32))

    ref = dht_layer_reference(x, vote_index, conv_w, conv_b, gamma, beta,
                              running_mean, running_var)

    # Intended use: preprocess the vote table once, reuse it for every forward.
    prep = prepare_vote_index(vote_index)
    out = dht_layer_forward(x, prep, conv_w, conv_b, gamma, beta,
                            running_mean, running_var)
    out = jax.block_until_ready(out)
    assert out.shape == (B, Cout, h, w)
    assert jnp.allclose(out, ref, atol=2e-2, rtol=2e-2), "DHT_Layer mismatch vs reference"

    # Standalone HT module (in-kernel ReLU + normalisation) on the raw input.
    ht_ref = ht_reference(x, vote_index)
    ht_out = jax.block_until_ready(ht_forward(x, prep))
    assert jnp.allclose(ht_out, ht_ref, atol=2e-2, rtol=2e-2), "HT mismatch vs reference"

    # Tiny VMEM budget forces the K-tiled path that accumulates into the output block.
    prep_small = prepare_vote_index(vote_index, budget_bytes=1 << 20)
    assert prep_small["use_acc"]
    out2 = dht_layer_forward(x, prep_small, conv_w, conv_b, gamma, beta,
                             running_mean, running_var)
    out2 = jax.block_until_ready(out2)
    assert jnp.allclose(out2, ref, atol=2e-2, rtol=2e-2), "K-tiled path mismatch vs reference"

    print("KERNEL_OK")
</pallas_src>

<mosaic_0001>
module attributes {stable_mosaic.version = 11 : i64} {
  func.func @_conv_bn_relu_kernel(%arg0: i32, %arg1: i32, %arg2: memref<1x8x384xf32, #tpu.memory_space<vmem>>, %arg3: memref<16x8xf32, #tpu.memory_space<vmem>>, %arg4: memref<16x1xf32, #tpu.memory_space<vmem>>, %arg5: memref<1x16x384xf32, #tpu.memory_space<vmem>>) attributes {dimension_semantics = [#tpu.dimension_semantics<parallel>, #tpu.dimension_semantics<parallel>], iteration_bounds = array<i64: 2, 1>, scalar_prefetch = 0 : i64, scratch_operands = 0 : i64, tpu.core_type = #tpu.core_type<tc>, window_params = [{transform_indices = @transform_0, window_bounds = array<i64: 1, 8, 384>}, {pipeline_mode = #tpu.pipeline_mode<synchronous>, transform_indices = @transform_1, window_bounds = array<i64: 16, 8>}, {pipeline_mode = #tpu.pipeline_mode<synchronous>, transform_indices = @transform_2, window_bounds = array<i64: 16, 1>}, {transform_indices = @transform_3, window_bounds = array<i64: 1, 16, 384>}]} {
    %c0 = arith.constant 0 : index
    %c0_0 = arith.constant 0 : index
    %0 = vector.load %arg3[%c0, %c0_0] : memref<16x8xf32, #tpu.memory_space<vmem>>, vector<16x8xf32>
    %c0_1 = arith.constant 0 : index
    %c0_2 = arith.constant 0 : index
    %c0_3 = arith.constant 0 : index
    %1 = vector.load %arg2[%c0_1, %c0_2, %c0_3] : memref<1x8x384xf32, #tpu.memory_space<vmem>>, vector<1x8x384xf32>
    %2 = vector.shape_cast %1 : vector<1x8x384xf32> to vector<8x384xf32>
    %cst = arith.constant dense<0.000000e+00> : vector<16x384xf32>
    %3 = tpu.matmul %0, %2, %cst {dimension_numbers = #tpu.dot_dimension_numbers<[1], [0], [0], [1], [0, 0, 1, 1], [], []>} : vector<16x8xf32>, vector<8x384xf32>, vector<16x384xf32> -> vector<16x384xf32>
    %c0_4 = arith.constant 0 : index
    %c0_5 = arith.constant 0 : index
    %4 = vector.load %arg4[%c0_4, %c0_5] : memref<16x1xf32, #tpu.memory_space<vmem>>, vector<16x1xf32>
    %5 = vector.broadcast %4 : vector<16x1xf32> to vector<16x384xf32>
    %6 = arith.addf %3, %5 : vector<16x384xf32>
    %cst_6 = arith.constant 0.000000e+00 : f32
    %7 = vector.broadcast %cst_6 : f32 to vector<16x384xf32>
    %8 = arith.maximumf %6, %7 : vector<16x384xf32>
    %c0_7 = arith.constant 0 : index
    %c0_8 = arith.constant 0 : index
    %c0_9 = arith.constant 0 : index
    %9 = vector.load %arg5[%c0_7, %c0_8, %c0_9] : memref<1x16x384xf32, #tpu.memory_space<vmem>>, vector<1x16x384xf32>
    %10 = vector.shape_cast %9 : vector<1x16x384xf32> to vector<16x384xf32>
    %11 = vector.shape_cast %8 : vector<16x384xf32> to vector<1x16x384xf32>
    tpu.vector_store %arg5[%c0_7, %c0_8, %c0_9], %11 {strides = array<i32>} : memref<1x16x384xf32, #tpu.memory_space<vmem>>, vector<1x16x384xf32>,
    return
  }
  func.func @transform_0(%arg0: i32, %arg1: i32) -> (i32, i32, i32) {
    %c0_i32 = arith.constant 0 : i32
    %c0_i32_0 = arith.constant 0 : i32
    return %arg0, %c0_i32, %arg1 : i32, i32, i32
  }
  func.func @transform_1(%arg0: i32, %arg1: i32) -> (i32, i32) {
    %c0_i32 = arith.constant 0 : i32
    %c0_i32_0 = arith.constant 0 : i32
    %c0_i32_1 = arith.constant 0 : i32
    return %c0_i32, %c0_i32_0 : i32, i32
  }
  func.func @transform_2(%arg0: i32, %arg1: i32) -> (i32, i32) {
    %c0_i32 = arith.constant 0 : i32
    %c0_i32_0 = arith.constant 0 : i32
    %c0_i32_1 = arith.constant 0 : i32
    return %c0_i32, %c0_i32_0 : i32, i32
  }
  func.func @transform_3(%arg0: i32, %arg1: i32) -> (i32, i32, i32) {
    %c0_i32 = arith.constant 0 : i32
    %c0_i32_0 = arith.constant 0 : i32
    return %arg0, %c0_i32, %arg1 : i32, i32, i32
  }
}

</mosaic_0001>

<bundles_post_ra>
// kernel: tpu_custom_call.1
= control target key start
LH: loop header
LB: loop body
LE: loop exit
PB: predicated region body
PF: predicated region fallthrough
CT: control target
= control target key end

     0   :  { %8 = vsyncpa [#allocation3], 0  ;;  %s916_s0 = inlined_call_operand.hbm [shape: f32[2,8,384], index: 0, kind: input, shape index: {}]   ;;  %s917_s1 = inlined_call_operand.vmem [shape: f32[16,8], index: 1, kind: input, shape index: {}]   ;;  %s918_s2 = inlined_call_operand.vmem [shape: f32[16,1], index: 2, kind: input, shape index: {}]   ;;  %s919_s3 = inlined_call_operand.hbm [shape: f32[2,16,384], index: 3, kind: output, shape index: {}]  }
   0x1   :  { %10 = vsyncpa [#allocation3 + $0x1], 0 }
   0x2   :  { %11 = vsyncpa [#allocation4], 0 }
   0x3   :  { %13 = vsyncpa [#allocation4 + $0x1], 0  ;;  %s731_s12 = smov 0   ;;  %s733_s13 = smov 0  }
   0x4   :  { %s735_s14 = smov 0   ;;  %s737_s15 = smov 0  }
   0x5   :  { %s739_s16 = smov 0   ;;  %s741_s17 = smov 0  }
   0x6 LB: > { %s498_s18 = sadd.s32 4294967295, %s703_s17   ;;  %s499_s19 = sadd.s32 4294967294, %s703_s17   ;;  %s703_s17 = sphi %s741_s17, %s19_s17   ;;  %s699_s16 = sphi %s739_s16, %s934_s16   ;;  %s695_s15 = sphi %s737_s15, %s933_s15   ;;  %s691_s14 = sphi %s735_s14, %s932_s14   ;;  %s687_s13 = sphi %s733_s13, %s931_s13   ;;  %s683_s12 = sphi %s731_s12, %s930_s12  }
   0x7   : > { %s31_s20 = sadd.s32 1, %s699_s16  ;;  %s40_s21 = sadd.s32 1, %s691_s14 }
   0x8   : > { %p33_p0 = scmp.ge.s32.totalorder %s31_s20, 2  ;;  %p47_p1 = scmp.ne.s32.totalorder %s691_s14, %s687_s13 }
   0x9   : > { %p48_p2 = scmp.eq.s32.totalorder %s703_s17, 0  ;;  %p53_p3 = scmp.ne.s32.totalorder %s687_s13, %s683_s12 }
   0xa   : > { %s936_s20 = smov (%p33_p0, %s31_s20), 0  ;;  %p54_p5 = scmp.eq.s32.totalorder %s498_s18, 0 }
   0xb   : > { %p772_p4 = por %p48_p2, %p47_p1  ;;  %s35_s23 = ssub.s32 %s699_s16, %s936_s20 }
   0xc   : > { %p121_p6 = scmp.eq.s32.totalorder %s498_s18, 1  ;;  %p38_p7 = scmp.eq.s32.totalorder %s35_s23, 0 }
   0xd   : > { %p778_p8 = por %p54_p5, %p53_p3  ;;  %p127_p10 = scmp.eq.s32.totalorder %s499_s19, 1 }
   0xe   : > { %p782_p9 = por %p121_p6, %p47_p1  ;;  %p536_p13 = scmp.lt.s32.totalorder %s703_s17, 2 }
   0xf   : > { %s787_s26 = scalar_select %p38_p7, %s691_s14, %s40_s21  }
  0x10   : > { %s923_s25 = scalar_select %p782_p9, 1, 0 }
  0x11   : > { %p789_p11 = por %p127_p10, %p53_p3  ;;  %s153_s28 = sand.u32 1, %s691_s14  }
  0x12   : > { %s519_s29 = smul.u32 24, %s153_s28  ;;  %p799_p0 = pnand %p536_p13, %p772_p4 }
  0x13   : > { %s924_s27 = scalar_select %p789_p11, 1, 0 }
  0x14   : > { %s520_s30 = smul.u32 384, %s699_s16  ;;  %s157_s8 = scalar_lea.vmem [#allocation2], %s519_s29 }
  0x15   : > { %s167_s9 = sshll.u32 %s157_s8, 4  ;;  %s154_s10 = scalar_lea.sflag [#allocation3], %s153_s28  ;;  %s809_s9 = int_to_ptr.vmem [resolvable:$true] %s167_s9 }
  0x16   : > { %s807_s7 = scalar_lea.hbm %s916_s0, %s520_s30  ;;  %p593_p3 = pneg %p799_p0 }
  0x17   : > { %s591_s11 = scalar_lea.hbm %s807_s7, 384  ;;  %s596_s21 = scalar_lea.hbm %s916_s0, 768 }
  0x18   : > { %p592_p2 = scmp.ne.s32.totalorder %s807_s7, %s591_s11  ;;  %p597_p6 = scmp.lt.u32.totalorder %s807_s7, %s916_s0 }
  0x19   : > { %p598_p7 = scmp.lt.u32.totalorder %s596_s21, %s591_s11  ;;  %p600_p13 = scmp.lt.u32.totalorder %s591_s11, %s807_s7 }
  0x1a   : > { %p594_p4 = pnand %p593_p3, %p592_p2 }
  0x1b   : > { %p599_p10 = por %p598_p7, %p597_p6 }
  0x1c   : > { %p595_p5 = pneg %p594_p4 }
  0x1d   : > { %p601_p12 = por %p600_p13, %p599_p10 }
  0x1f   : > { %p602_p1 = pnand %p601_p12, %p595_p5 }
  0x21   : > { %605 = shalt.err (!%p602_p1)
}
  0x22   : > { %s606_s28 = scalar_lea.vmem %s809_s9, 384  ;;  %s705_s29 = smov [#allocation2]  }
  0x23   : > { %p607_p2 = scmp.ne.s32.totalorder %s809_s9, %s606_s28  ;;  %s611_s30 = sshll.u32 %s705_s29, 4  ;;  %s612_s30 = int_to_ptr.vmem [resolvable:$false] %s611_s30 }
  0x24   : > { %s613_s5 = scalar_lea.vmem %s612_s30, 768  ;;  %p614_p9 = scmp.lt.s32.totalorder %s809_s9, %s612_s30 }
  0x25   : > { %p609_p4 = pnand %p607_p2, %p593_p3  ;;  %p615_p6 = scmp.lt.s32.totalorder %s613_s5, %s606_s28 }
  0x27   : > { %p610_p11 = pneg %p609_p4  ;;  %p616_p7 = por %p615_p6, %p614_p9 }
  0x29   : > { %p617_p10 = pnand %p616_p7, %p610_p11 }
  0x2b   : > { %620 = shalt.err (!%p617_p10)
}
  0x2c   : > { %531 = dma.hbm_to_vmem [thread:$0]  (!%p799_p0), %s807_s7, 384, %s809_s9, %s154_s10  }
  0x2d   : > { %p172_p12 = scmp.lt.s32.totalorder %s703_s17, 3  ;;  %p926_p1 = scmp.ge.s32.totalorder %s703_s17, 1 }
  0x2f   : > { %p173_p3 = pnand %p926_p1, %p172_p12 }
  0x30   : > { %s840_s6 = sand.u32 (!%p173_p3), 1, %s687_s13  }
  0x31   : > { %176 = sbr.rel (%p173_p3) target bundleno = 297 (0x129), region = 32  ;;  %s179_s11 = scalar_lea.sflag (!%p173_p3), [#allocation3], %s840_s6 }
  0x32   : > { %s521_s8 = smul.u32 (!%p173_p3), 24, %s840_s6 }
  0x34   : > { %s182_s18 = scalar_lea.vmem (!%p173_p3), [#allocation2], %s521_s8 }
  0x38   : > { %674 = dma.done.wait (%p778_p8), %s179_s11, 384  }
  0x39   : > { %676 = vsyncadd (%p778_p8), %s179_s11, 4294966912  ;;  %v706_v0 = vmov 0.0   ;;  %v707_v1 = vmov 0   ;;  %v210_v2 = vld [vmem:[%s182_s18 + $0x8] sm:$0xff]  ;;  %v211_v3 = vld [vmem:[%s182_s18 + $0x10] sm:$0xff]  ;;  %vm224_vm0 = vcmask 64512  }
  0x3a   : > { %295 = vmatprep.mubr.f32.mxu0 %v706_v0  ;;  %590 = vset.pattern.permute.xlu0 %v707_v1  ;;  %v209_v4 = vld [vmem:[%s182_s18] sm:$0xff]  ;;  %v208_v6 = vld [vmem:[%s917_s1 + $0x8] sm:$0xff]  ;;  %s522_s23 = smul.u32 48, %s840_s6  ;;  %s396_s11 = scalar_lea.sflag [#allocation4], %s840_s6 }
  0x3b   : > { %231 = vmatprep.subr.mxu0 %v210_v2  ;;  %514 = vmatprep.subr.mxu1 %v211_v3  ;;  %v207_v5 = vld [vmem:[%s917_s1] sm:$0xff]  ;;  %v213_v8 = vld [vmem:[%s918_s2 + $0x8] sm:$0xff]  ;;  %s523_s30 = smul.u32 768, %s695_s15  ;;  %p927_p9 = scmp.ne.s32.totalorder %s923_s25, 0 }
  0x3c   : > { %232 = vmatpush1.msra.mxu0 %v209_v4  ;;  %515 = vmatpush3.msra.mxu1 %v211_v3  ;;  %v212_v7 = vld [vmem:[%s918_s2] sm:$0xff]  ;;  %s204_s28 = scalar_lea.vmem [#allocation5], %s522_s23  ;;  %s708_s4 = smov [#allocation5]  }
  0x3d   : > { %516 = vmatprep.mubr.msk.f32.mxu1 %vm224_vm0, %v207_v5  ;;  %504 = vmatmul.mubr.msk.f32.vlgmr.msra.gmra.mrb[0].mxu0 %vm224_vm0, %v207_v5  ;;  %s411_s29 = sshll.u32 %s204_s28, 4  ;;  %s867_s15 = scalar_lea.hbm %s919_s3, %s523_s30  ;;  %s862_s29 = int_to_ptr.vmem [resolvable:$true] %s411_s29 }
  0x3e   : > { %517 = vmatmul.mubr.msk.f32.vlgmr.msra.gmra.mrb[0].mxu1 %vm224_vm0, %v208_v6  ;;  %301 = vmatprep.mubr.f32.mxu0 %v706_v0  ;;  %s621_s18 = scalar_lea.vmem %s862_s29, 768  ;;  %s625_s7 = sshll.u32 %s708_s4, 4  ;;  %s626_s7 = int_to_ptr.vmem [resolvable:$false] %s625_s7 }
  0x3f   : > { %216 = vperm.xlu0 %590, %v212_v7   ;;  %p622_p8 = scmp.ne.s32.totalorder %s862_s29, %s621_s18  ;;  %s627_s9 = scalar_lea.vmem %s626_s7, 1536 }
  0x40   : > { %p628_p5 = scmp.lt.s32.totalorder %s862_s29, %s626_s7  ;;  %p629_p13 = scmp.lt.s32.totalorder %s627_s9, %s621_s18 }
  0x41   : > { %505 = vmatmul.mubr.msk.f32.gmra.mrb[2].mxu0 %vm224_vm0, %v208_v6  ;;  %p623_p11 = pnand %p622_p8, %p927_p9 }
  0x42   : > { %p630_p2 = por %p629_p13, %p628_p5 }
  0x43   : > { %221 = vperm.xlu0 %590, %v213_v8   ;;  %p624_p0 = pneg %p623_p11 }
  0x45   : > { %p631_p4 = pnand %p630_p2, %p624_p0 }
  0xbe   : > { %v217_v9 = vpop.permute.xlu0 %216 }
  0xc2   : > { %v222_v10 = vpop.permute.xlu0 %221 }
 0x110   : > { %v297_v11 = vpop.f32.mrb[0].mxu0 }
 0x111   : > { %v298_v12 = vadd.f32 %v297_v11, %v217_v9  ;;  %v518_v13 = vpop.f32.mrb[0].mxu1  ;;  %v299_v14 = vpop.f32.mrb[1].mxu0 }
 0x112   : > { %v380_v15 = vadd.f32 %v518_v13, %v222_v10  ;;  %v300_v16 = vadd.f32 %v299_v14, %v217_v9  ;;  %v374_v17 = vpop.f32.mrb[1].mxu1 }
 0x113   : > { %v383_v18 = vmax.f32 %v298_v12, 0.0  ;;  %v375_v19 = vadd.f32 %v374_v17, %v217_v9 }
 0x114   : > { %v388_v20 = vmax.f32 %v380_v15, 0.0  ;;  %v384_v21 = vmax.f32 %v300_v16, 0.0  ;;  %v303_v22 = vpop.f32.mrb[2].mxu0 }
 0x115   : > { %389 = vst [vmem:[%s204_s28] sm:$0xff] %v383_v18  ;;  %v385_v23 = vmax.f32 %v375_v19, 0.0  ;;  %v304_v24 = vadd.f32 %v303_v22, %v222_v10  ;;  %v305_v25 = vpop.f32.mrb[3].mxu0 }
 0x116   : > { %394 = vst [vmem:[%s204_s28 + $0x28] sm:$0xff] %v388_v20  ;;  %390 = vst [vmem:[%s204_s28 + $0x8] sm:$0xff] %v384_v21  ;;  %v306_v26 = vadd.f32 %v305_v25, %v222_v10 }
 0x117   : > { %391 = vst [vmem:[%s204_s28 + $0x10] sm:$0xff] %v385_v23  ;;  %v386_v27 = vmax.f32 %v304_v24, 0.0 }
 0x118   : > { %v387_v28 = vmax.f32 %v306_v26, 0.0 }
 0x119   : > { %392 = vst [vmem:[%s204_s28 + $0x18] sm:$0xff] %v386_v27 }
 0x11a   : > { %393 = vst [vmem:[%s204_s28 + $0x20] sm:$0xff] %v387_v28 }
 0x11b   : > { %634 = shalt.err (!%p631_p4)
}
 0x11c   : > { %s635_s10 = scalar_lea.hbm %s867_s15, 768  ;;  %s639_s21 = scalar_lea.hbm %s919_s3, 1536 }
 0x11d   : > { %p636_p6 = scmp.ne.s32.totalorder %s867_s15, %s635_s10  ;;  %p640_p12 = scmp.lt.u32.totalorder %s867_s15, %s919_s3 }
 0x11e   : > { %p641_p1 = scmp.lt.u32.totalorder %s639_s21, %s635_s10  ;;  %p643_p8 = scmp.lt.u32.totalorder %s635_s10, %s867_s15 }
 0x11f   : > { %p637_p7 = pnand %p636_p6, %p927_p9 }
 0x120   : > { %p642_p3 = por %p641_p1, %p640_p12 }
 0x121   : > { %p638_p10 = pneg %p637_p7 }
 0x122   : > { %p644_p11 = por %p643_p8, %p642_p3 }
 0x124   : > { %p645_p0 = pnand %p644_p11, %p638_p10 }
 0x126   : > { %648 = shalt.err (!%p645_p0)
}
 0x127   : > { %s709_s28 = smov 384   ;;  %s710_s30 = smov 24  }
 0x128   : > { %526 = dma.vmem_to_hbm [thread:$0]  (%p927_p9), %s862_s29, 768, %s867_s15, %s396_s11, %s709_s28, %s709_s28, %s710_s30  }
 0x129 PF: > { %s426_s5 = sand.u32 1, %s683_s12   ;;  %p928_p5 = scmp.ne.s32.totalorder %s924_s27, 0 }
 0x12a   : > { %p929_p13 = scmp.ge.s32.totalorder %s703_s17, 2  ;;  %s427_s8 = scalar_lea.sflag [#allocation4], %s426_s5 }
 0x12c   : > { %p533_p2 = pnand %p929_p13, %p928_p5 }
 0x12e   : > { %678 = dma.done.wait (!%p533_p2), %s427_s8, 768  }
 0x12f   : > { %680 = vsyncadd (!%p533_p2), %s427_s8, 4294966528  ;;  %s19_s17 = sadd.s32 1, %s703_s17   ;;  %s930_s12 = smov %s687_s13 }
 0x130   : > { %p16_p4 = scmp.ge.s32.totalorder %s19_s17, 4   ;;  %s931_s13 = smov %s691_s14 }
 0x131   : > { %s932_s14 = smov %s787_s26  ;;  %s933_s15 = smov %s699_s16 }
 0x132   : > { %s934_s16 = smov %s936_s20  ;;  %18 = sbr.rel (!%p16_p4) target bundleno = 6 (0x6), region = 77 }
 0x139   :  { %432 = vsyncpa [#allocation3], 1 }
 0x13a   :  { %434 = vsyncpa [#allocation3 + $0x1], 1 }
 0x13b   :  { %435 = vsyncpa [#allocation4], 1 }
 0x13c   :  { %437 = vsyncpa [#allocation4 + $0x1], 1 }

</bundles_post_ra>
